<compile_context>
chip_gen: v6e
topology: v6e:2x2x1
jax: 0.10.0
libtpu: 0.0.40
codegen_flags: <defaults>
</compile_context>

<pallas_src>
import functools

import jax
import jax.numpy as jnp
from jax.experimental import pallas as pl
from jax.experimental.pallas import tpu as pltpu

EPS = 1e-5


def _bn_relu_kernel(x_ref, p_ref, o_ref, *, inv_count):
    # x_ref: (Cb, HW) f32 in VMEM. p_ref: (Cb, 2) with [:,0]=gamma, [:,1]=beta.
    # Pass 1: per-channel mean (lane-axis XLU reduction).
    mean = jnp.sum(x_ref[...], axis=1, keepdims=True) * inv_count        # (Cb, 1)

    # Pass 2: centered sum-of-squares -> biased variance (two-pass, stable).
    var = jnp.sum((x_ref[...] - mean) ** 2, axis=1, keepdims=True) * inv_count
    inv_std = jax.lax.rsqrt(var + EPS)                                   # (Cb, 1)

    # Fold affine into a single scale/bias pair (computed once per channel).
    scale = inv_std * p_ref[:, 0:1]                                      # (Cb, 1)
    bias = p_ref[:, 1:2] - mean * scale                                  # (Cb, 1)

    # Elementwise pass: mul + add + relu only, re-reading x from VMEM.
    o_ref[...] = jnp.maximum(x_ref[...] * scale + bias, 0.0).astype(o_ref.dtype)


def _num_channel_blocks(c):
    """Split channels across TensorCores only on multi-TC chips (v7x)."""
    try:
        kind = jax.devices()[0].device_kind.lower()
    except Exception:
        return 1
    if "v7" in kind and c % 16 == 0:   # c//2 must stay a multiple of 8
        return 2
    return 1


def batchnorm_relu(x_nchw, gamma, beta):
    """Training-mode BatchNorm2d + ReLU.

    x_nchw: (N, C, H, W) float32; gamma/beta: (C,) float32.
    """
    n, c, h, w = x_nchw.shape
    hw = n * h * w
    inv_count = float(1.0 / hw)

    # Channels-major 2-D view (C, N*H*W).  For N == 1 this is a free reshape.
    if n == 1:
        x2d = x_nchw.reshape(c, h * w)
    else:
        x2d = jnp.transpose(x_nchw, (1, 0, 2, 3)).reshape(c, hw)

    # Pack gamma/beta into a single (C, 2) parameter array -> one DMA.
    params = jnp.stack([gamma, beta], axis=1).astype(jnp.float32)

    kernel = functools.partial(_bn_relu_kernel, inv_count=inv_count)
    out_shape = jax.ShapeDtypeStruct((c, hw), x_nchw.dtype)
    cost = pl.CostEstimate(
        flops=7 * c * hw,
        transcendentals=c,
        bytes_accessed=2 * c * hw * 4 + 2 * c * 4,
    )

    nb = _num_channel_blocks(c)
    if nb == 1:
        # Grid-less: whole problem in one VMEM-resident block (v5e / v6e).
        out2d = pl.pallas_call(
            kernel,
            out_shape=out_shape,
            in_specs=[
                pl.BlockSpec((c, hw), lambda: (0, 0)),
                pl.BlockSpec((c, 2), lambda: (0, 0)),
            ],
            out_specs=pl.BlockSpec((c, hw), lambda: (0, 0)),
            cost_estimate=cost,
        )(x2d, params)
    else:
        # Channel-parallel grid: each TensorCore handles c//nb channels (v7x).
        cb = c // nb
        out2d = pl.pallas_call(
            kernel,
            out_shape=out_shape,
            grid=(nb,),
            in_specs=[
                pl.BlockSpec((cb, hw), lambda i: (i, 0)),
                pl.BlockSpec((cb, 2), lambda i: (i, 0)),
            ],
            out_specs=pl.BlockSpec((cb, hw), lambda i: (i, 0)),
            compiler_params=pltpu.CompilerParams(
                dimension_semantics=("parallel",)),
            cost_estimate=cost,
        )(x2d, params)

    # Free view back to NCHW (inverse of the channels-major view above).
    if n == 1:
        return out2d.reshape(n, c, h, w)
    return jnp.transpose(out2d.reshape(c, n, h, w), (1, 0, 2, 3))


def _reference(x_nchw, gamma, beta):
    # Pure-JAX reference of training-mode BatchNorm2d + ReLU (two-pass stats).
    mean = jnp.mean(x_nchw, axis=(0, 2, 3), keepdims=True)
    var = jnp.mean((x_nchw - mean) ** 2, axis=(0, 2, 3), keepdims=True)
    y = (x_nchw - mean) * jax.lax.rsqrt(var + EPS)
    y = y * gamma[None, :, None, None] + beta[None, :, None, None]
    return jnp.maximum(y, 0.0)


if __name__ == "__main__":
    key = jax.random.PRNGKey(0)
    kx, kg, kb = jax.random.split(key, 3)

    # Shapes consistent with the module: BatchNorm2d(192) on [1, 192, 14, 14].
    N, C, H, W = 1, 192, 14, 14
    x = jax.random.normal(kx, (N, C, H, W), dtype=jnp.float32)

    # Non-trivial affine parameters (PyTorch default would be gamma=1, beta=0;
    # perturb to exercise the affine path).
    gamma = 1.0 + 0.1 * jax.random.normal(kg, (C,), dtype=jnp.float32)
    beta = 0.1 * jax.random.normal(kb, (C,), dtype=jnp.float32)

    out = batchnorm_relu(x, gamma, beta)
    jax.block_until_ready(out)

    ref = _reference(x, gamma, beta)
    assert out.shape == (N, C, H, W)
    assert jnp.allclose(out, ref, atol=1e-4, rtol=1e-4), "mismatch vs reference"

    print("KERNEL_OK")
</pallas_src>

<mosaic_0001>
module attributes {stable_mosaic.version = 11 : i64} {
  func.func @_bn_relu_kernel(%arg0: memref<192x196xf32, #tpu.memory_space<vmem>>, %arg1: memref<192x2xf32, #tpu.memory_space<vmem>>, %arg2: memref<192x196xf32, #tpu.memory_space<vmem>>) attributes {dimension_semantics = [], scalar_prefetch = 0 : i64, scratch_operands = 0 : i64, tpu.core_type = #tpu.core_type<tc>} {
    %c0 = arith.constant 0 : index
    %c0_0 = arith.constant 0 : index
    %0 = vector.load %arg0[%c0, %c0_0] : memref<192x196xf32, #tpu.memory_space<vmem>>, vector<192x196xf32>
    %cst = arith.constant dense<0.000000e+00> : vector<192xf32>
    %1 = vector.multi_reduction <add>, %0, %cst [1] : vector<192x196xf32> to vector<192xf32>
    %2 = vector.shape_cast %1 : vector<192xf32> to vector<192x1xf32>
    %cst_1 = arith.constant 0.00510204071 : f32
    %3 = vector.broadcast %cst_1 : f32 to vector<192x1xf32>
    %4 = arith.mulf %2, %3 : vector<192x1xf32>
    %c0_2 = arith.constant 0 : index
    %c0_3 = arith.constant 0 : index
    %5 = vector.load %arg0[%c0_2, %c0_3] : memref<192x196xf32, #tpu.memory_space<vmem>>, vector<192x196xf32>
    %6 = vector.broadcast %4 : vector<192x1xf32> to vector<192x196xf32>
    %7 = arith.subf %5, %6 : vector<192x196xf32>
    %8 = arith.mulf %7, %7 : vector<192x196xf32>
    %cst_4 = arith.constant dense<0.000000e+00> : vector<192xf32>
    %9 = vector.multi_reduction <add>, %8, %cst_4 [1] : vector<192x196xf32> to vector<192xf32>
    %10 = vector.shape_cast %9 : vector<192xf32> to vector<192x1xf32>
    %cst_5 = arith.constant 0.00510204071 : f32
    %11 = vector.broadcast %cst_5 : f32 to vector<192x1xf32>
    %12 = arith.mulf %10, %11 : vector<192x1xf32>
    %cst_6 = arith.constant 9.99999974E-6 : f32
    %13 = vector.broadcast %cst_6 : f32 to vector<192x1xf32>
    %14 = arith.addf %12, %13 : vector<192x1xf32>
    %15 = math.rsqrt %14 : vector<192x1xf32>
    %c0_7 = arith.constant 0 : index
    %c0_8 = arith.constant 0 : index
    %16 = vector.load %arg1[%c0_7, %c0_8] : memref<192x2xf32, #tpu.memory_space<vmem>>, vector<192x1xf32>
    %17 = arith.mulf %15, %16 : vector<192x1xf32>
    %c0_9 = arith.constant 0 : index
    %c1 = arith.constant 1 : index
    %18 = vector.load %arg1[%c0_9, %c1] : memref<192x2xf32, #tpu.memory_space<vmem>>, vector<192x1xf32>
    %19 = arith.mulf %4, %17 : vector<192x1xf32>
    %20 = arith.subf %18, %19 : vector<192x1xf32>
    %c0_10 = arith.constant 0 : index
    %c0_11 = arith.constant 0 : index
    %21 = vector.load %arg0[%c0_10, %c0_11] : memref<192x196xf32, #tpu.memory_space<vmem>>, vector<192x196xf32>
    %22 = vector.broadcast %17 : vector<192x1xf32> to vector<192x196xf32>
    %23 = arith.mulf %21, %22 : vector<192x196xf32>
    %24 = vector.broadcast %20 : vector<192x1xf32> to vector<192x196xf32>
    %25 = arith.addf %23, %24 : vector<192x196xf32>
    %cst_12 = arith.constant 0.000000e+00 : f32
    %26 = vector.broadcast %cst_12 : f32 to vector<192x196xf32>
    %27 = arith.maximumf %25, %26 : vector<192x196xf32>
    %c0_13 = arith.constant 0 : index
    %c0_14 = arith.constant 0 : index
    %28 = vector.load %arg2[%c0_13, %c0_14] : memref<192x196xf32, #tpu.memory_space<vmem>>, vector<192x196xf32>
    tpu.vector_store %arg2[%c0_13, %c0_14], %27 {strides = array<i32>} : memref<192x196xf32, #tpu.memory_space<vmem>>, vector<192x196xf32>,
    return
  }
}

</mosaic_0001>

<bundles_post_ra>
// kernel: tpu_custom_call.1
= control target key start
LH: loop header
LB: loop body
LE: loop exit
PB: predicated region body
PF: predicated region fallthrough
CT: control target
= control target key end

     0   :  { %7 = vsyncpa [#allocation3], 0  ;;  %s2009_s0 = inlined_call_operand.hbm [shape: f32[192,196], index: 0, kind: input, shape index: {}]   ;;  %s2010_s1 = inlined_call_operand.vmem [shape: f32[192,2], index: 1, kind: input, shape index: {}]   ;;  %s2011_s2 = inlined_call_operand.hbm [shape: f32[192,196], index: 2, kind: output, shape index: {}]  }
   0x1   :  { %8 = vsyncpa [#allocation4], 0  ;;  %s1251_s9 = smov [#allocation2]  }
   0x2   :  { %s14_s10 = sshll.u32 %s1251_s9, 4  ;;  %s15_s10 = int_to_ptr.vmem [resolvable:$true] %s14_s10 }
   0x3   :  { %s1215_s11 = scalar_lea.vmem %s15_s10, 6144  ;;  %p1220_p1 = scmp.lt.s32.totalorder %s15_s10, %s15_s10 }
   0x4   :  { %p1216_p0 = scmp.ne.s32.totalorder %s15_s10, %s1215_s11  ;;  %p1221_p2 = scmp.lt.s32.totalorder %s1215_s11, %s1215_s11 }
   0x6   :  { %p1222_p3 = por %p1221_p2, %p1220_p1 }
   0x8   :  { %p1223_p4 = pnand %p1222_p3, %p1216_p0 }
   0xa   :  { %1226 = shalt.err (!%p1223_p4)
}
   0xb   :  { %s1252_s12 = smov 256   ;;  %s1253_s13 = smov 16  }
   0xc   :  { %20 = dma.hbm_to_vmem [thread:$0]  %s2009_s0, 6144, %s15_s10, [#allocation3], %s1252_s12, %s1252_s12, %s1253_s13  }
   0xd   :  { %1247 = dma.done.wait [#allocation3], 6144  }
   0xe   :  { %1248 = vsyncadd [#allocation3], 4294961152  ;;  %vm74_vm0 = vcmask 556032   ;;  %v1279_v0 = vld [vmem:[#allocation2] sm:$0xff]  ;;  %v1281_v1 = vld [vmem:[#allocation2 + $0x8] sm:$0xff]  ;;  %s1255_s26 = smov 1  }
   0xf   :  { %v1283_v2 = vld [vmem:[#allocation2 + $0x20] sm:$0xff]  ;;  %v75_v3 = vsel %vm74_vm0, %v1281_v1, 0.0  ;;  %v1287_v4 = vld [vmem:[#allocation2 + $0x28] sm:$0xff]  ;;  %v1289_v5 = vld [vmem:[#allocation2 + $0x10] sm:$0xff] }
  0x10   :  { %v1291_v6 = vld [vmem:[#allocation2 + $0x18] sm:$0xff]  ;;  %v76_v7 = vadd.f32 %v75_v3, %v1279_v0  ;;  %v83_v8 = vsel %vm74_vm0, %v1287_v4, 0.0  ;;  %v1298_v10 = vld [vmem:[#allocation2 + $0x30] sm:$0xff]  ;;  %v1305_v14 = vld [vmem:[#allocation2 + $0x48] sm:$0xff] }
  0x11   :  { %v79_v9 = vsel %vm74_vm0, %v1291_v6, 0.0  ;;  %v1300_v11 = vld [vmem:[#allocation2 + $0x38] sm:$0xff]  ;;  %v84_v12 = vadd.f32 %v83_v8, %v1283_v2  ;;  %v1311_v18 = vld [vmem:[#allocation2 + $0x40] sm:$0xff]  ;;  %v91_v19 = vsel %vm74_vm0, %v1305_v14, 0.0  ;;  %v1315_v20 = vld [vmem:[#allocation2 + $0x50] sm:$0xff] }
  0x12   :  { %v87_v13 = vsel %vm74_vm0, %v1300_v11, 0.0  ;;  %v1307_v15 = vld [vmem:[#allocation2 + $0x58] sm:$0xff]  ;;  %77 = vadd.xlane.f32.xlu0 %v76_v7  ;;  %v80_v16 = vadd.f32 %v79_v9, %v1289_v5  ;;  %v1319_v22 = vld [vmem:[#allocation2 + $0x68] sm:$0xff]  ;;  %v92_v24 = vadd.f32 %v91_v19, %v1311_v18  ;;  %v1325_v26 = vld [vmem:[#allocation2 + $0x60] sm:$0xff] }
  0x13   :  { %85 = vadd.xlane.f32.xlu1 %v84_v12  ;;  %v88_v17 = vadd.f32 %v87_v13, %v1298_v10  ;;  %v95_v21 = vsel %vm74_vm0, %v1307_v15, 0.0  ;;  %v1321_v23 = vld [vmem:[#allocation2 + $0x78] sm:$0xff]  ;;  %v99_v27 = vsel %vm74_vm0, %v1319_v22, 0.0  ;;  %v1329_v28 = vld [vmem:[#allocation2 + $0x70] sm:$0xff]  ;;  %v1333_v30 = vld [vmem:[#allocation2 + $0x88] sm:$0xff] }
  0x14   :  { %v96_v25 = vadd.f32 %v95_v21, %v1315_v20  ;;  %v103_v29 = vsel %vm74_vm0, %v1321_v23, 0.0  ;;  %v1335_v31 = vld [vmem:[#allocation2 + $0x98] sm:$0xff]  ;;  %v100_v32 = vadd.f32 %v99_v27, %v1325_v26  ;;  %v1339_v34 = vld [vmem:[#allocation2 + $0x80] sm:$0xff]  ;;  %v107_v35 = vsel %vm74_vm0, %v1333_v30, 0.0  ;;  %v1343_v36 = vld [vmem:[#allocation2 + $0x90] sm:$0xff] }
  0x15   :  { %v104_v33 = vadd.f32 %v103_v29, %v1329_v28  ;;  %v111_v37 = vsel %vm74_vm0, %v1335_v31, 0.0  ;;  %v1347_v38 = vld [vmem:[#allocation2 + $0xa8] sm:$0xff]  ;;  %v1349_v39 = vld [vmem:[#allocation2 + $0xb8] sm:$0xff]  ;;  %v108_v40 = vadd.f32 %v107_v35, %v1339_v34  ;;  %v1353_v42 = vld [vmem:[#allocation2 + $0xa0] sm:$0xff] }
  0x16   :  { %81 = vadd.xlane.f32.xlu0 %v80_v16  ;;  %v112_v41 = vadd.f32 %v111_v37, %v1343_v36  ;;  %v115_v43 = vsel %vm74_vm0, %v1347_v38, 0.0  ;;  %v1357_v44 = vld [vmem:[#allocation2 + $0xb0] sm:$0xff]  ;;  %v119_v45 = vsel %vm74_vm0, %v1349_v39, 0.0  ;;  %v1361_v46 = vld [vmem:[#allocation2 + $0xc8] sm:$0xff]  ;;  %v1363_v47 = vld [vmem:[#allocation2 + $0xd8] sm:$0xff] }
  0x17   :  { %89 = vadd.xlane.f32.xlu1 %v88_v17  ;;  %v116_v48 = vadd.f32 %v115_v43, %v1353_v42  ;;  %v120_v49 = vadd.f32 %v119_v45, %v1357_v44  ;;  %v1367_v50 = vld [vmem:[#allocation2 + $0xc0] sm:$0xff]  ;;  %v123_v51 = vsel %vm74_vm0, %v1361_v46, 0.0  ;;  %v1371_v52 = vld [vmem:[#allocation2 + $0xd0] sm:$0xff]  ;;  %v127_v53 = vsel %vm74_vm0, %v1363_v47, 0.0  ;;  %v1375_v54 = vld [vmem:[#allocation2 + $0xe8] sm:$0xff] }
  0x18   :  { %v1377_v55 = vld [vmem:[#allocation2 + $0xf8] sm:$0xff]  ;;  %v124_v56 = vadd.f32 %v123_v51, %v1367_v50  ;;  %v128_v57 = vadd.f32 %v127_v53, %v1371_v52  ;;  %v1381_v58 = vld [vmem:[#allocation2 + $0xe0] sm:$0xff]  ;;  %v131_v59 = vsel %vm74_vm0, %v1375_v54, 0.0  ;;  %v1385_v60 = vld [vmem:[#allocation2 + $0xf0] sm:$0xff] }
  0x19   :  { %v135_v61 = vsel %vm74_vm0, %v1377_v55, 0.0  ;;  %v1389_v62 = vld [vmem:[#allocation2 + $0x108] sm:$0xff]  ;;  %v1391_v63 = vld [vmem:[#allocation2 + $0x118] sm:$0xff]  ;;  %v132_v3 = vadd.f32 %v131_v59, %v1381_v58  ;;  %v1395_v8 = vld [vmem:[#allocation2 + $0x100] sm:$0xff] }
  0x1a   :  { %93 = vadd.xlane.f32.xlu0 %v92_v24  ;;  %v136_v7 = vadd.f32 %v135_v61, %v1385_v60  ;;  %v139_v9 = vsel %vm74_vm0, %v1389_v62, 0.0  ;;  %v1399_v12 = vld [vmem:[#allocation2 + $0x110] sm:$0xff]  ;;  %v143_v13 = vsel %vm74_vm0, %v1391_v63, 0.0  ;;  %v1403_v16 = vld [vmem:[#allocation2 + $0x128] sm:$0xff]  ;;  %v1405_v17 = vld [vmem:[#allocation2 + $0x138] sm:$0xff] }
  0x1b   :  { %97 = vadd.xlane.f32.xlu1 %v96_v25  ;;  %v140_v19 = vadd.f32 %v139_v9, %v1395_v8  ;;  %v144_v21 = vadd.f32 %v143_v13, %v1399_v12  ;;  %v1409_v24 = vld [vmem:[#allocation2 + $0x120] sm:$0xff]  ;;  %v147_v25 = vsel %vm74_vm0, %v1403_v16, 0.0  ;;  %v1413_v27 = vld [vmem:[#allocation2 + $0x130] sm:$0xff]  ;;  %v151_v29 = vsel %vm74_vm0, %v1405_v17, 0.0 }
  0x1c   :  { %v148_v35 = vadd.f32 %v147_v25, %v1409_v24  ;;  %v152_v37 = vadd.f32 %v151_v29, %v1413_v27  ;;  %v1427_v43 = vld [vmem:[#allocation2 + $0x150] sm:$0xff] }
  0x1d   :  { %v1441_v59 = vld [vmem:[#allocation2 + $0x170] sm:$0xff] }
  0x1e   :  { %101 = vadd.xlane.f32.xlu0 %v100_v32  ;;  %v1417_v32 = vld [vmem:[#allocation2 + $0x148] sm:$0xff] }
  0x1f   :  { %105 = vadd.xlane.f32.xlu1 %v104_v33  ;;  %v1419_v33 = vld [vmem:[#allocation2 + $0x158] sm:$0xff] }
  0x20   :  { %v159_v45 = vsel %vm74_vm0, %v1419_v33, 0.0 }
  0x21   :  { %v160_v53 = vadd.f32 %v159_v45, %v1427_v43 }
  0x22   :  { %109 = vadd.xlane.f32.xlu0 %v108_v40  ;;  %v1423_v40 = vld [vmem:[#allocation2 + $0x140] sm:$0xff] }
  0x23   :  { %113 = vadd.xlane.f32.xlu1 %v112_v41  ;;  %v155_v41 = vsel %vm74_vm0, %v1417_v32, 0.0 }
  0x24   :  { %v156_v51 = vadd.f32 %v155_v41, %v1423_v40 }
  0x26   :  { %117 = vadd.xlane.f32.xlu0 %v116_v48  ;;  %v1431_v48 = vld [vmem:[#allocation2 + $0x168] sm:$0xff] }
  0x27   :  { %121 = vadd.xlane.f32.xlu1 %v120_v49  ;;  %v1433_v49 = vld [vmem:[#allocation2 + $0x178] sm:$0xff] }
  0x28   :  { %v167_v61 = vsel %vm74_vm0, %v1433_v49, 0.0 }
  0x2a   :  { %125 = vadd.xlane.f32.xlu0 %v124_v56  ;;  %v1437_v56 = vld [vmem:[#allocation2 + $0x160] sm:$0xff] }
  0x2b   :  { %129 = vadd.xlane.f32.xlu1 %v128_v57  ;;  %v163_v57 = vsel %vm74_vm0, %v1431_v48, 0.0 }
  0x2e   :  { %133 = vadd.xlane.f32.xlu0 %v132_v3  ;;  %v164_v3 = vadd.f32 %v163_v57, %v1437_v56 }
  0x2f   :  { %137 = vadd.xlane.f32.xlu1 %v136_v7  ;;  %v168_v7 = vadd.f32 %v167_v61, %v1441_v59 }
  0x32   :  { %141 = vadd.xlane.f32.xlu0 %v140_v19 }
  0x33   :  { %145 = vadd.xlane.f32.xlu1 %v144_v21 }
  0x36   :  { %149 = vadd.xlane.f32.xlu0 %v148_v35 }
  0x37   :  { %153 = vadd.xlane.f32.xlu1 %v152_v37 }
  0x3a   :  { %157 = vadd.xlane.f32.xlu0 %v156_v51 }
  0x3b   :  { %161 = vadd.xlane.f32.xlu1 %v160_v53 }
  0x3e   :  { %165 = vadd.xlane.f32.xlu0 %v164_v3 }
  0x3f   :  { %169 = vadd.xlane.f32.xlu1 %v168_v7 }
  0x9b   :  { %v78_v9 = vpop.xlane.xlu0 %77 }
  0x9c   :  { %v1447_v13 = vmul.f32 0.0051020407, %v78_v9  ;;  %v86_v19 = vpop.xlane.xlu1 %85 }
  0x9d   :  { %v1449_v21 = vmul.f32 0.0051020407, %v86_v19 }
  0x9e   :  { %v195_v25 = vsub.f32 %v1279_v0, %v1447_v13  ;;  %v196_v29 = vsub.f32 %v1281_v1, %v1447_v13 }
  0x9f   :  { %2017 = vst [vmem:[#allocation8_spill] sm:$0xff] %v1449_v21  ;;  %v82_v35 = vpop.xlane.xlu0 %81  ;;  %v199_v37 = vsub.f32 %v1283_v2, %v1449_v21  ;;  %v200_v41 = vsub.f32 %v1287_v4, %v1449_v21 }
  0xa0   :  { %v1459_v45 = vmul.f32 0.0051020407, %v82_v35  ;;  %v90_v51 = vpop.xlane.xlu1 %89  ;;  %v243_v53 = vmul.f32 %v195_v25, %v195_v25  ;;  %v244_v57 = vmul.f32 %v196_v29, %v196_v29 }
  0xa1   :  { %v1461_v61 = vmul.f32 0.0051020407, %v90_v51  ;;  %v247_v3 = vmul.f32 %v199_v37, %v199_v37  ;;  %v248_v7 = vmul.f32 %v200_v41, %v200_v41 }
  0xa2   :  { %v291_v0 = vsel %vm74_vm0, %v244_v57, 0.0  ;;  %v197_v1 = vsub.f32 %v1289_v5, %v1459_v45  ;;  %v198_v2 = vsub.f32 %v1291_v6, %v1459_v45 }
  0xa3   :  { %v94_v9 = vpop.xlane.xlu0 %93  ;;  %v292_v19 = vadd.f32 %v291_v0, %v243_v53  ;;  %v299_v4 = vsel %vm74_vm0, %v248_v7, 0.0  ;;  %v201_v25 = vsub.f32 %v1298_v10, %v1461_v61  ;;  %v202_v29 = vsub.f32 %v1300_v11, %v1461_v61 }
  0xa4   :  { %v1473_v35 = vmul.f32 0.0051020407, %v94_v9  ;;  %v98_v37 = vpop.xlane.xlu1 %97  ;;  %v245_v41 = vmul.f32 %v197_v1, %v197_v1  ;;  %v246_v51 = vmul.f32 %v198_v2, %v198_v2  ;;  %v300_v57 = vadd.f32 %v299_v4, %v247_v3 }
  0xa5   :  { %293 = vadd.xlane.f32.xlu0 %v292_v19  ;;  %v1475_v5 = vmul.f32 0.0051020407, %v98_v37  ;;  %v249_v6 = vmul.f32 %v201_v25, %v201_v25  ;;  %v250_v21 = vmul.f32 %v202_v29, %v202_v29 }
  0xa6   :  { %v295_v53 = vsel %vm74_vm0, %v246_v51, 0.0  ;;  %v203_v7 = vsub.f32 %v1311_v18, %v1473_v35  ;;  %v204_v10 = vsub.f32 %v1305_v14, %v1473_v35 }
  0xa7   :  { %v102_v11 = vpop.xlane.xlu0 %101  ;;  %v296_v0 = vadd.f32 %v295_v53, %v245_v41  ;;  %v303_v9 = vsel %vm74_vm0, %v250_v21, 0.0  ;;  %v205_v1 = vsub.f32 %v1315_v20, %v1475_v5  ;;  %v206_v3 = vsub.f32 %v1307_v15, %v1475_v5 }
  0xa8   :  { %v1487_v2 = vmul.f32 0.0051020407, %v102_v11  ;;  %v106_v19 = vpop.xlane.xlu1 %105  ;;  %v251_v4 = vmul.f32 %v203_v7, %v203_v7  ;;  %v252_v25 = vmul.f32 %v204_v10, %v204_v10  ;;  %v304_v14 = vadd.f32 %v303_v9, %v249_v6 }
  0xa9   :  { %301 = vadd.xlane.f32.xlu0 %v300_v57  ;;  %297 = vadd.xlane.f32.xlu1 %v296_v0  ;;  %v1489_v18 = vmul.f32 0.0051020407, %v106_v19  ;;  %v253_v29 = vmul.f32 %v205_v1, %v205_v1  ;;  %v254_v37 = vmul.f32 %v206_v3, %v206_v3 }
  0xaa   :  { %v307_v21 = vsel %vm74_vm0, %v252_v25, 0.0  ;;  %v207_v20 = vsub.f32 %v1325_v26, %v1487_v2  ;;  %v208_v15 = vsub.f32 %v1319_v22, %v1487_v2 }
  0xab   :  { %v110_v41 = vpop.xlane.xlu0 %109  ;;  %v308_v51 = vadd.f32 %v307_v21, %v251_v4  ;;  %v311_v53 = vsel %vm74_vm0, %v254_v37, 0.0  ;;  %v209_v57 = vsub.f32 %v1329_v28, %v1489_v18  ;;  %v210_v6 = vsub.f32 %v1321_v23, %v1489_v18 }
  0xac   :  { %v1501_v7 = vmul.f32 0.0051020407, %v110_v41  ;;  %v114_v10 = vpop.xlane.xlu1 %113  ;;  %v255_v11 = vmul.f32 %v207_v20, %v207_v20  ;;  %v256_v0 = vmul.f32 %v208_v15, %v208_v15  ;;  %v312_v22 = vadd.f32 %v311_v53, %v253_v29 }
  0xad   :  { %305 = vadd.xlane.f32.xlu1 %v304_v14  ;;  %309 = vadd.xlane.f32.xlu0 %v308_v51  ;;  %v1503_v26 = vmul.f32 0.0051020407, %v114_v10  ;;  %v257_v9 = vmul.f32 %v209_v57, %v209_v57  ;;  %v258_v1 = vmul.f32 %v210_v6, %v210_v6 }
  0xae   :  { %v315_v3 = vsel %vm74_vm0, %v256_v0, 0.0  ;;  %v211_v28 = vsub.f32 %v1339_v34, %v1501_v7  ;;  %v212_v23 = vsub.f32 %v1333_v30, %v1501_v7 }
  0xaf   :  { %v118_v19 = vpop.xlane.xlu0 %117  ;;  %v316_v4 = vadd.f32 %v315_v3, %v255_v11  ;;  %v319_v25 = vsel %vm74_vm0, %v258_v1, 0.0  ;;  %v213_v14 = vsub.f32 %v1343_v36, %v1503_v26  ;;  %v214_v29 = vsub.f32 %v1335_v31, %v1503_v26 }
  0xb0   :  { %v1515_v37 = vmul.f32 0.0051020407, %v118_v19  ;;  %v122_v21 = vpop.xlane.xlu1 %121  ;;  %v259_v20 = vmul.f32 %v211_v28, %v211_v28  ;;  %v260_v15 = vmul.f32 %v212_v23, %v212_v23  ;;  %v320_v30 = vadd.f32 %v319_v25, %v257_v9 }
  0xb1   :  { %313 = vadd.xlane.f32.xlu1 %v312_v22  ;;  %317 = vadd.xlane.f32.xlu0 %v316_v4  ;;  %v1517_v34 = vmul.f32 0.0051020407, %v122_v21  ;;  %v261_v41 = vmul.f32 %v213_v14, %v213_v14  ;;  %v262_v51 = vmul.f32 %v214_v29, %v214_v29 }
  0xb2   :  { %v323_v53 = vsel %vm74_vm0, %v260_v15, 0.0  ;;  %v215_v36 = vsub.f32 %v1353_v42, %v1515_v37  ;;  %v216_v31 = vsub.f32 %v1347_v38, %v1515_v37 }
  0xb3   :  { %v126_v57 = vpop.xlane.xlu0 %125  ;;  %v324_v6 = vadd.f32 %v323_v53, %v259_v20  ;;  %v327_v10 = vsel %vm74_vm0, %v262_v51, 0.0  ;;  %v217_v11 = vsub.f32 %v1357_v44, %v1517_v34  ;;  %v218_v0 = vsub.f32 %v1349_v39, %v1517_v34 }
  0xb4   :  { %v1529_v22 = vmul.f32 0.0051020407, %v126_v57  ;;  %v130_v9 = vpop.xlane.xlu1 %129  ;;  %v263_v1 = vmul.f32 %v215_v36, %v215_v36  ;;  %v264_v3 = vmul.f32 %v216_v31, %v216_v31  ;;  %v328_v38 = vadd.f32 %v327_v10, %v261_v41 }
  0xb5   :  { %321 = vadd.xlane.f32.xlu1 %v320_v30  ;;  %325 = vadd.xlane.f32.xlu0 %v324_v6  ;;  %v1531_v42 = vmul.f32 0.0051020407, %v130_v9  ;;  %v265_v28 = vmul.f32 %v217_v11, %v217_v11  ;;  %v266_v23 = vmul.f32 %v218_v0, %v218_v0 }
  0xb6   :  { %v331_v19 = vsel %vm74_vm0, %v264_v3, 0.0  ;;  %v219_v44 = vsub.f32 %v1367_v50, %v1529_v22  ;;  %v220_v39 = vsub.f32 %v1361_v46, %v1529_v22 }
  0xb7   :  { %v134_v4 = vpop.xlane.xlu0 %133  ;;  %v332_v25 = vadd.f32 %v331_v19, %v263_v1  ;;  %v335_v14 = vsel %vm74_vm0, %v266_v23, 0.0  ;;  %v221_v29 = vsub.f32 %v1371_v52, %v1531_v42  ;;  %v222_v21 = vsub.f32 %v1363_v47, %v1531_v42 }
  0xb8   :  { %v1543_v20 = vmul.f32 0.0051020407, %v134_v4  ;;  %v138_v15 = vpop.xlane.xlu1 %137  ;;  %v267_v30 = vmul.f32 %v219_v44, %v219_v44  ;;  %v268_v41 = vmul.f32 %v220_v39, %v220_v39  ;;  %v336_v46 = vadd.f32 %v335_v14, %v265_v28 }
  0xb9   :  { %329 = vadd.xlane.f32.xlu1 %v328_v38  ;;  %333 = vadd.xlane.f32.xlu0 %v332_v25  ;;  %v1545_v50 = vmul.f32 0.0051020407, %v138_v15  ;;  %v269_v51 = vmul.f32 %v221_v29, %v221_v29  ;;  %v270_v53 = vmul.f32 %v222_v21, %v222_v21 }
  0xba   :  { %v339_v36 = vsel %vm74_vm0, %v268_v41, 0.0  ;;  %v223_v52 = vsub.f32 %v1381_v58, %v1543_v20  ;;  %v224_v47 = vsub.f32 %v1375_v54, %v1543_v20 }
  0xbb   :  { %v142_v31 = vpop.xlane.xlu0 %141  ;;  %v340_v57 = vadd.f32 %v339_v36, %v267_v30  ;;  %v343_v6 = vsel %vm74_vm0, %v270_v53, 0.0  ;;  %v225_v10 = vsub.f32 %v1385_v60, %v1545_v50  ;;  %v226_v11 = vsub.f32 %v1377_v55, %v1545_v50 }
  0xbc   :  { %v1557_v0 = vmul.f32 0.0051020407, %v142_v31  ;;  %v146_v9 = vpop.xlane.xlu1 %145  ;;  %v271_v1 = vmul.f32 %v223_v52, %v223_v52  ;;  %v272_v3 = vmul.f32 %v224_v47, %v224_v47  ;;  %v344_v54 = vadd.f32 %v343_v6, %v269_v51 }
  0xbd   :  { %337 = vadd.xlane.f32.xlu1 %v336_v46  ;;  %341 = vadd.xlane.f32.xlu0 %v340_v57  ;;  %v1559_v58 = vmul.f32 0.0051020407, %v146_v9  ;;  %v273_v38 = vmul.f32 %v225_v10, %v225_v10  ;;  %v274_v28 = vmul.f32 %v226_v11, %v226_v11  ;;  %v1254_v31 = vmov 0  }
  0xbe   :  { %v347_v23 = vsel %vm74_vm0, %v272_v3, 0.0  ;;  %v227_v60 = vsub.f32 %v1395_v8, %v1557_v0  ;;  %v228_v55 = vsub.f32 %v1389_v62, %v1557_v0  ;;  %1107 = vset.pattern.permute.xlu0 %v1254_v31  ;;  %1108 = vset.pattern.permute.xlu1 %v1254_v31 }
  0xbf   :  { %v150_v19 = vpop.xlane.xlu0 %149  ;;  %v348_v44 = vadd.f32 %v347_v23, %v271_v1  ;;  %v351_v39 = vsel %vm74_vm0, %v274_v28, 0.0  ;;  %v229_v4 = vsub.f32 %v1399_v12, %v1559_v58  ;;  %v230_v25 = vsub.f32 %v1391_v63, %v1559_v58 }
  0xc0   :  { %v1571_v14 = vmul.f32 0.0051020407, %v150_v19  ;;  %v154_v29 = vpop.xlane.xlu1 %153  ;;  %v275_v21 = vmul.f32 %v227_v60, %v227_v60  ;;  %v276_v15 = vmul.f32 %v228_v55, %v228_v55  ;;  %v352_v62 = vadd.f32 %v351_v39, %v273_v38 }
  0xc1   :  { %345 = vadd.xlane.f32.xlu1 %v344_v54  ;;  %349 = vadd.xlane.f32.xlu0 %v348_v44  ;;  %v1573_v8 = vmul.f32 0.0051020407, %v154_v29  ;;  %v277_v30 = vmul.f32 %v229_v4, %v229_v4  ;;  %v278_v41 = vmul.f32 %v230_v25, %v230_v25 }
  0xc2   :  { %v355_v46 = vsel %vm74_vm0, %v276_v15, 0.0  ;;  %v231_v12 = vsub.f32 %v1409_v24, %v1571_v14  ;;  %v232_v63 = vsub.f32 %v1403_v16, %v1571_v14 }
  0xc3   :  { %v158_v51 = vpop.xlane.xlu0 %157  ;;  %v356_v53 = vadd.f32 %v355_v46, %v275_v21  ;;  %v359_v36 = vsel %vm74_vm0, %v278_v41, 0.0  ;;  %v233_v52 = vsub.f32 %v1413_v27, %v1573_v8  ;;  %v234_v47 = vsub.f32 %v1405_v17, %v1573_v8 }
  0xc4   :  { %v1585_v57 = vmul.f32 0.0051020407, %v158_v51  ;;  %v162_v6 = vpop.xlane.xlu1 %161  ;;  %v279_v24 = vmul.f32 %v231_v12, %v231_v12  ;;  %v280_v10 = vmul.f32 %v232_v63, %v232_v63  ;;  %v360_v11 = vadd.f32 %v359_v36, %v277_v30 }
  0xc5   :  { %353 = vadd.xlane.f32.xlu1 %v352_v62  ;;  %357 = vadd.xlane.f32.xlu0 %v356_v53  ;;  %v1587_v16 = vmul.f32 0.0051020407, %v162_v6  ;;  %v281_v9 = vmul.f32 %v233_v52, %v233_v52  ;;  %v282_v1 = vmul.f32 %v234_v47, %v234_v47 }
  0xc6   :  { %v363_v27 = vsel %vm74_vm0, %v280_v10, 0.0  ;;  %v235_v17 = vsub.f32 %v1423_v40, %v1585_v57  ;;  %v236_v3 = vsub.f32 %v1417_v32, %v1585_v57 }
  0xc7   :  { %v166_v54 = vpop.xlane.xlu0 %165  ;;  %v364_v38 = vadd.f32 %v363_v27, %v279_v24  ;;  %v367_v28 = vsel %vm74_vm0, %v282_v1, 0.0  ;;  %v237_v23 = vsub.f32 %v1427_v43, %v1587_v16  ;;  %v238_v60 = vsub.f32 %v1419_v33, %v1587_v16 }
  0xc8   :  { %v1599_v55 = vmul.f32 0.0051020407, %v166_v54  ;;  %v170_v19 = vpop.xlane.xlu1 %169  ;;  %v283_v44 = vmul.f32 %v235_v17, %v235_v17  ;;  %v284_v39 = vmul.f32 %v236_v3, %v236_v3  ;;  %v368_v32 = vadd.f32 %v367_v28, %v281_v9 }
  0xc9   :  { %361 = vadd.xlane.f32.xlu1 %v360_v11  ;;  %365 = vadd.xlane.f32.xlu0 %v364_v38  ;;  %v1601_v40 = vmul.f32 0.0051020407, %v170_v19  ;;  %v285_v4 = vmul.f32 %v237_v23, %v237_v23  ;;  %v286_v25 = vmul.f32 %v238_v60, %v238_v60 }
  0xca   :  { %v371_v29 = vsel %vm74_vm0, %v284_v39, 0.0  ;;  %v239_v43 = vsub.f32 %v1437_v56, %v1599_v55  ;;  %v240_v33 = vsub.f32 %v1431_v48, %v1599_v55 }
  0xcb   :  { %v372_v21 = vadd.f32 %v371_v29, %v283_v44  ;;  %v375_v15 = vsel %vm74_vm0, %v286_v25, 0.0  ;;  %v241_v62 = vsub.f32 %v1441_v59, %v1601_v40  ;;  %v242_v30 = vsub.f32 %v1433_v49, %v1601_v40 }
  0xcc   :  { %v287_v41 = vmul.f32 %v239_v43, %v239_v43  ;;  %v288_v46 = vmul.f32 %v240_v33, %v240_v33  ;;  %v376_v12 = vadd.f32 %v375_v15, %v285_v4  ;;  %v1618_v4 = vld [vmem:[%s2010_s1] sm:$0xff] }
  0xcd   :  { %369 = vadd.xlane.f32.xlu1 %v368_v32  ;;  %373 = vadd.xlane.f32.xlu0 %v372_v21  ;;  %v289_v63 = vmul.f32 %v241_v62, %v241_v62  ;;  %v290_v51 = vmul.f32 %v242_v30, %v242_v30 }
  0xce   :  { %v379_v56 = vsel %vm74_vm0, %v288_v46, 0.0 }
  0xcf   :  { %v380_v53 = vadd.f32 %v379_v56, %v287_v41  ;;  %v383_v48 = vsel %vm74_vm0, %v290_v51, 0.0  ;;  %v1626_v41 = vld [vmem:[%s2010_s1 + $0x8] sm:$0xff] }
  0xd0   :  { %v384_v36 = vadd.f32 %v383_v48, %v289_v63 }
  0xd1   :  { %377 = vadd.xlane.f32.xlu1 %v376_v12  ;;  %381 = vadd.xlane.f32.xlu0 %v380_v53 }
  0xd5   :  { %385 = vadd.xlane.f32.xlu1 %v384_v36  ;;  %v1635_v36 = vld [vmem:[%s2010_s1 + $0x10] sm:$0xff] }
 0x12e   :  { %v294_v59 = vpop.xlane.xlu0 %293 }
 0x12f   :  { %v387_v52 = vmul.f32 0.0051020407, %v294_v59 }
 0x131   :  { %v411_v47 = vadd.f32 1e-05, %v387_v52 }
 0x132   :  { %v298_v49 = vpop.xlane.xlu1 %297  ;;  %v302_v31 = vpop.xlane.xlu0 %301 }
 0x133   :  { %1111 = vrsqrt.f32 %v411_v47  ;;  %v388_v6 = vmul.f32 0.0051020407, %v298_v49  ;;  %v389_v24 = vmul.f32 0.0051020407, %v302_v31  ;;  %v1640_v47 = vld [vmem:[%s2010_s1 + $0x18] sm:$0xff] }
 0x135   :  { %v412_v10 = vadd.f32 1e-05, %v388_v6  ;;  %v413_v11 = vadd.f32 1e-05, %v389_v24 }
 0x136   :  { %v306_v9 = vpop.xlane.xlu1 %305  ;;  %v310_v1 = vpop.xlane.xlu0 %309 }
 0x137   :  { %1113 = vrsqrt.f32 %v412_v10  ;;  %v390_v27 = vmul.f32 0.0051020407, %v306_v9  ;;  %v391_v17 = vmul.f32 0.0051020407, %v310_v1 }
 0x138   :  { %1115 = vrsqrt.f32 %v413_v11 }
 0x139   :  { %v414_v3 = vadd.f32 1e-05, %v390_v27  ;;  %v415_v54 = vadd.f32 1e-05, %v391_v17  ;;  %v1652_v27 = vld [vmem:[%s2010_s1 + $0x20] sm:$0xff] }
 0x13a   :  { %v314_v38 = vpop.xlane.xlu1 %313  ;;  %v318_v28 = vpop.xlane.xlu0 %317 }
 0x13b   :  { %1117 = vrsqrt.f32 %v414_v3  ;;  %v392_v23 = vmul.f32 0.0051020407, %v314_v38  ;;  %v393_v60 = vmul.f32 0.0051020407, %v318_v28 }
 0x13c   :  { %1119 = vrsqrt.f32 %v415_v54  ;;  %v1657_v54 = vld [vmem:[%s2010_s1 + $0x28] sm:$0xff] }
 0x13d   :  { %v416_v19 = vadd.f32 1e-05, %v392_v23  ;;  %v417_v44 = vadd.f32 1e-05, %v393_v60 }
 0x13e   :  { %v322_v39 = vpop.xlane.xlu1 %321  ;;  %v326_v32 = vpop.xlane.xlu0 %325 }
 0x13f   :  { %1121 = vrsqrt.f32 %v416_v19  ;;  %v394_v25 = vmul.f32 0.0051020407, %v322_v39  ;;  %v395_v29 = vmul.f32 0.0051020407, %v326_v32 }
 0x140   :  { %v1112_v43 = vpop.eup %1111  ;;  %1123 = vrsqrt.f32 %v417_v44 }
 0x141   :  { %v418_v33 = vadd.f32 1e-05, %v394_v25  ;;  %v419_v21 = vadd.f32 1e-05, %v395_v29  ;;  %v1621_v15 = vmul.f32 %v1112_v43, %v1618_v4  ;;  %v1670_v25 = vld [vmem:[%s2010_s1 + $0x30] sm:$0xff] }
 0x142   :  { %v330_v62 = vpop.xlane.xlu1 %329  ;;  %v334_v30 = vpop.xlane.xlu0 %333 }
 0x143   :  { %1125 = vrsqrt.f32 %v418_v33  ;;  %v396_v46 = vmul.f32 0.0051020407, %v330_v62  ;;  %v397_v12 = vmul.f32 0.0051020407, %v334_v30  ;;  %653 = vperm.xlu0 %1107, %v1621_v15   ;;  %v1675_v33 = vld [vmem:[%s2010_s1 + $0x38] sm:$0xff] }
 0x144   :  { %v1114_v63 = vpop.eup %1113  ;;  %1127 = vrsqrt.f32 %v419_v21 }
 0x145   :  { %v1116_v51 = vpop.eup %1115  ;;  %v420_v56 = vadd.f32 1e-05, %v396_v46  ;;  %v421_v53 = vadd.f32 1e-05, %v397_v12  ;;  %v1630_v48 = vmul.f32 %v1114_v63, %v1626_v41 }
 0x146   :  { %v338_v59 = vpop.xlane.xlu1 %337  ;;  %v342_v52 = vpop.xlane.xlu0 %341  ;;  %v1644_v24 = vmul.f32 %v1116_v51, %v1635_v36 }
 0x147   :  { %1129 = vrsqrt.f32 %v420_v56  ;;  %v398_v49 = vmul.f32 0.0051020407, %v338_v59  ;;  %v399_v31 = vmul.f32 0.0051020407, %v342_v52  ;;  %658 = vperm.xlu1 %1108, %v1630_v48  }
 0x148   :  { %v1118_v6 = vpop.eup %1117  ;;  %1131 = vrsqrt.f32 %v421_v53  ;;  %v1688_v53 = vld [vmem:[%s2010_s1 + $0x40] sm:$0xff] }
 0x149   :  { %v1120_v10 = vpop.eup %1119  ;;  %v422_v11 = vadd.f32 1e-05, %v398_v49  ;;  %v423_v9 = vadd.f32 1e-05, %v399_v31  ;;  %v1647_v1 = vmul.f32 %v1118_v6, %v1640_v47  ;;  %v1693_v49 = vld [vmem:[%s2010_s1 + $0x48] sm:$0xff] }
 0x14a   :  { %v346_v17 = vpop.xlane.xlu1 %345  ;;  %v350_v3 = vpop.xlane.xlu0 %349  ;;  %v1662_v60 = vmul.f32 %v1120_v10, %v1652_v27 }
 0x14b   :  { %1133 = vrsqrt.f32 %v422_v11  ;;  %v400_v38 = vmul.f32 0.0051020407, %v346_v17  ;;  %v401_v28 = vmul.f32 0.0051020407, %v350_v3  ;;  %668 = vperm.xlu0 %1107, %v1647_v1   ;;  %663 = vperm.xlu1 %1108, %v1644_v24  }
 0x14c   :  { %v1122_v23 = vpop.eup %1121  ;;  %1135 = vrsqrt.f32 %v423_v9 }
 0x14d   :  { %v1124_v19 = vpop.eup %1123  ;;  %v424_v44 = vadd.f32 1e-05, %v400_v38  ;;  %v425_v39 = vadd.f32 1e-05, %v401_v28  ;;  %v1665_v32 = vmul.f32 %v1122_v23, %v1657_v54  ;;  %v1704_v28 = vld [vmem:[%s2010_s1 + $0x58] sm:$0xff]  ;;  %v1709_v23 = vld [vmem:[%s2010_s1 + $0x50] sm:$0xff] }
 0x14e   :  { %v354_v29 = vpop.xlane.xlu1 %353  ;;  %v358_v43 = vpop.xlane.xlu0 %357  ;;  %v1680_v46 = vmul.f32 %v1124_v19, %v1670_v25 }
 0x14f   :  { %1137 = vrsqrt.f32 %v424_v44  ;;  %v402_v21 = vmul.f32 0.0051020407, %v354_v29  ;;  %v403_v62 = vmul.f32 0.0051020407, %v358_v43  ;;  %678 = vperm.xlu0 %1107, %v1665_v32   ;;  %673 = vperm.xlu1 %1108, %v1662_v60   ;;  %v1719_v43 = vld [vmem:[%s2010_s1 + $0x68] sm:$0xff] }
 0x150   :  { %v1126_v30 = vpop.eup %1125  ;;  %1139 = vrsqrt.f32 %v425_v39  ;;  %2018 = vst [vmem:[#allocation9_spill] sm:$0xff] %v1719_v43 }
 0x151   :  { %v1128_v12 = vpop.eup %1127  ;;  %v426_v63 = vadd.f32 1e-05, %v402_v21  ;;  %v427_v51 = vadd.f32 1e-05, %v403_v62  ;;  %v1683_v56 = vmul.f32 %v1126_v30, %v1675_v33  ;;  %v1724_v21 = vld [vmem:[%s2010_s1 + $0x60] sm:$0xff] }
 0x152   :  { %v362_v59 = vpop.xlane.xlu1 %361  ;;  %v366_v52 = vpop.xlane.xlu0 %365  ;;  %v491_v11 = vmul.f32 %v1128_v12, %v1688_v53 }
 0x153   :  { %1141 = vrsqrt.f32 %v426_v63  ;;  %v404_v31 = vmul.f32 0.0051020407, %v362_v59  ;;  %v405_v6 = vmul.f32 0.0051020407, %v366_v52  ;;  %688 = vperm.xlu0 %1107, %v1683_v56   ;;  %683 = vperm.xlu1 %1108, %v1680_v46   ;;  %v1739_v59 = vld [vmem:[%s2010_s1 + $0x70] sm:$0xff] }
 0x154   :  { %v1130_v10 = vpop.eup %1129  ;;  %1143 = vrsqrt.f32 %v427_v51  ;;  %v1734_v51 = vld [vmem:[%s2010_s1 + $0x78] sm:$0xff] }
 0x155   :  { %v428_v9 = vadd.f32 1e-05, %v404_v31  ;;  %v429_v17 = vadd.f32 1e-05, %v405_v6  ;;  %v1699_v3 = vmul.f32 %v1130_v10, %v1693_v49  ;;  %v1132_v38 = vpop.eup %1131  ;;  %2019 = vst [vmem:[#allocation10_spill] sm:$0xff] %v1734_v51 }
 0x156   :  { %v493_v39 = vmul.f32 %v1132_v38, %v1709_v23 }
 0x157   :  { %1145 = vrsqrt.f32 %v428_v9  ;;  %698 = vperm.xlu0 %1107, %v1699_v3   ;;  %693 = vperm.xlu1 %1108, %v491_v11   ;;  %v1749_v9 = vld [vmem:[%s2010_s1 + $0x88] sm:$0xff] }
 0x158   :  { %v1134_v19 = vpop.eup %1133  ;;  %1147 = vrsqrt.f32 %v429_v17  ;;  %2020 = vst [vmem:[#allocation11_spill] sm:$0xff] %v1749_v9  ;;  %v1754_v17 = vld [vmem:[%s2010_s1 + $0x80] sm:$0xff] }
 0x159   :  { %v1713_v44 = vmul.f32 %v1134_v19, %v1704_v28  ;;  %v1136_v29 = vpop.eup %1135 }
 0x15a   :  { %v495_v12 = vmul.f32 %v1136_v29, %v1724_v21 }
 0x15b   :  { %708 = vperm.xlu0 %1107, %v1713_v44   ;;  %703 = vperm.xlu1 %1108, %v493_v39  }
 0x15c   :  { %v1138_v62 = vpop.eup %1137 }
 0x15d   :  { %v1728_v30 = vmul.f32 %v1138_v62, %v1719_v43  ;;  %v1140_v63 = vpop.eup %1139 }
 0x15e   :  { %v497_v6 = vmul.f32 %v1140_v63, %v1739_v59  ;;  %v1764_v63 = vld [vmem:[%s2010_s1 + $0x90] sm:$0xff] }
 0x15f   :  { %718 = vperm.xlu0 %1107, %v1728_v30   ;;  %713 = vperm.xlu1 %1108, %v495_v12   ;;  %2021 = vst [vmem:[#allocation12_spill] sm:$0xff] %v1764_v63 }
 0x160   :  { %v1142_v52 = vpop.eup %1141 }
 0x161   :  { %v1743_v31 = vmul.f32 %v1142_v52, %v1734_v51  ;;  %v1144_v10 = vpop.eup %1143  ;;  %v507_v52 = vmul.f32 %v1621_v15, %v1447_v13  ;;  %v513_v13 = vmul.f32 %v1680_v46, %v1487_v2  ;;  %v2022_v15 = vld [vmem:[#allocation8_spill] sm:$0xff] }
 0x162   :  { %v499_v29 = vmul.f32 %v1144_v10, %v1754_v17  ;;  %v511_v10 = vmul.f32 %v1662_v60, %v1473_v35 }
 0x163   :  { %728 = vperm.xlu0 %1107, %v1743_v31   ;;  %723 = vperm.xlu1 %1108, %v497_v6  }
 0x164   :  { %v1146_v38 = vpop.eup %1145 }
 0x165   :  { %v1758_v19 = vmul.f32 %v1146_v38, %v1749_v9  ;;  %v1148_v62 = vpop.eup %1147  ;;  %v374_v38 = vpop.xlane.xlu0 %373  ;;  %v508_v9 = vmul.f32 %v1630_v48, %v1459_v45  ;;  %v515_v45 = vmul.f32 %v491_v11, %v1501_v7  ;;  %v510_v48 = vmul.f32 %v1647_v1, %v1461_v61 }
 0x166   :  { %v501_v51 = vmul.f32 %v1148_v62, %v1764_v63  ;;  %v407_v43 = vmul.f32 0.0051020407, %v374_v38  ;;  %v509_v62 = vmul.f32 %v1644_v24, %v2022_v15  ;;  %v512_v24 = vmul.f32 %v1665_v32, %v1475_v5 }
 0x167   :  { %738 = vperm.xlu0 %1107, %v1758_v19   ;;  %733 = vperm.xlu1 %1108, %v499_v29   ;;  %v517_v38 = vmul.f32 %v493_v39, %v1515_v37  ;;  %v514_v61 = vmul.f32 %v1683_v56, %v1489_v18  ;;  %v519_v11 = vmul.f32 %v495_v12, %v1529_v22 }
 0x168   :  { %v431_v35 = vadd.f32 1e-05, %v407_v43  ;;  %v516_v5 = vmul.f32 %v1699_v3, %v1503_v26  ;;  %v521_v39 = vmul.f32 %v497_v6, %v1543_v20  ;;  %v523_v22 = vmul.f32 %v499_v29, %v1557_v0  ;;  %v1809_v26 = vld [vmem:[%s2010_s1 + $0xa0] sm:$0xff] }
 0x169   :  { %v382_v63 = vpop.xlane.xlu0 %381  ;;  %v518_v56 = vmul.f32 %v1713_v44, %v1517_v34  ;;  %v520_v20 = vmul.f32 %v1728_v30, %v1531_v42  ;;  %v525_v3 = vmul.f32 %v501_v51, %v1571_v14  ;;  %v1820_v34 = vld [vmem:[%s2010_s1 + $0xb0] sm:$0xff]  ;;  %v522_v44 = vmul.f32 %v1743_v31, %v1545_v50  ;;  %v1831_v30 = vld [vmem:[%s2010_s1 + $0x98] sm:$0xff]  ;;  %v1842_v31 = vld [vmem:[%s2010_s1 + $0xa8] sm:$0xff] }
 0x16a   :  { %v409_v60 = vmul.f32 0.0051020407, %v382_v63  ;;  %1149 = vrsqrt.f32 %v431_v35 }
 0x16b   :  { %555 = vrot.lane.b32.xlu0 %v507_v52, %s1255_s26  ;;  %743 = vperm.xlu1 %1108, %v501_v51   ;;  %v370_v52 = vpop.xlane.xlu1 %369  ;;  %v524_v51 = vmul.f32 %v1758_v19, %v1559_v58  ;;  %v1851_v58 = vld [vmem:[%s2010_s1 + $0xb8] sm:$0xff]  ;;  %s1257_s1 = smov [#allocation5]  }
 0x16c   :  { %v406_v46 = vmul.f32 0.0051020407, %v370_v52  ;;  %s1088_s9 = sshll.u32 %s1257_s1, 4  ;;  %s1089_s9 = int_to_ptr.vmem [resolvable:$true] %s1088_s9 }
 0x16d   :  { %s1227_s10 = scalar_lea.vmem %s1089_s9, 6144  ;;  %p1232_p6 = scmp.lt.s32.totalorder %s1089_s9, %s1089_s9 }
 0x16e   :  { %v430_v7 = vadd.f32 1e-05, %v406_v46  ;;  %p1228_p5 = scmp.ne.s32.totalorder %s1089_s9, %s1227_s10  ;;  %p1233_p7 = scmp.lt.s32.totalorder %s1227_s10, %s1227_s10 }
 0x16f   :  { %563 = vrot.lane.b32.xlu0 %v511_v10, %s1255_s26  ;;  %557 = vrot.lane.b32.xlu1 %v508_v9, %s1255_s26  ;;  %v378_v2 = vpop.xlane.xlu1 %377  ;;  %v433_v9 = vadd.f32 1e-05, %v409_v60 }
 0x170   :  { %v408_v1 = vmul.f32 0.0051020407, %v378_v2  ;;  %p1234_p8 = por %p1233_p7, %p1232_p6 }
 0x171   :  { %1151 = vrsqrt.f32 %v433_v9 }
 0x172   :  { %1153 = vrsqrt.f32 %v430_v7  ;;  %v432_v37 = vadd.f32 1e-05, %v408_v1  ;;  %p1235_p9 = pnand %p1234_p8, %p1228_p5 }
 0x173   :  { %567 = vrot.lane.b32.xlu0 %v513_v13, %s1255_s26  ;;  %559 = vrot.lane.b32.xlu1 %v509_v62, %s1255_s26  ;;  %v386_v43 = vpop.xlane.xlu1 %385  ;;  %v1256_v62 = vmov 1  }
 0x174   :  { %v410_v32 = vmul.f32 0.0051020407, %v386_v43  ;;  %1155 = vrsqrt.f32 %v432_v37 }
 0x176   :  { %v434_v18 = vadd.f32 1e-05, %v410_v32 }
 0x177   :  { %571 = vrot.lane.b32.xlu0 %v515_v45, %s1255_s26  ;;  %561 = vrot.lane.b32.xlu1 %v510_v48, %s1255_s26  ;;  %v1150_v12 = vpop.eup %1149 }
 0x178   :  { %1157 = vrsqrt.f32 %v434_v18  ;;  %v503_v0 = vmul.f32 %v1150_v12, %v1809_v26 }
 0x17a   :  { %v527_v29 = vmul.f32 %v503_v0, %v1585_v57 }
 0x17b   :  { %575 = vrot.lane.b32.xlu0 %v517_v38, %s1255_s26  ;;  %565 = vrot.lane.b32.xlu1 %v512_v24, %s1255_s26 }
 0x17e   :  { %v1152_v6 = vpop.eup %1151 }
 0x17f   :  { %579 = vrot.lane.b32.xlu0 %v519_v11, %s1255_s26  ;;  %569 = vrot.lane.b32.xlu1 %v514_v61, %s1255_s26  ;;  %v505_v42 = vmul.f32 %v1152_v6, %v1820_v34  ;;  %v1154_v14 = vpop.eup %1153 }
 0x180   :  { %v502_v50 = vmul.f32 %v1154_v14, %v1831_v30 }
 0x181   :  { %v529_v63 = vmul.f32 %v505_v42, %v1599_v55  ;;  %v1156_v57 = vpop.eup %1155 }
 0x182   :  { %v526_v10 = vmul.f32 %v502_v50, %v1573_v8  ;;  %v504_v13 = vmul.f32 %v1156_v57, %v1842_v31 }
 0x183   :  { %583 = vrot.lane.b32.xlu0 %v521_v39, %s1255_s26  ;;  %573 = vrot.lane.b32.xlu1 %v516_v5, %s1255_s26 }
 0x184   :  { %v528_v55 = vmul.f32 %v504_v13, %v1587_v16 }
 0x185   :  { %v1158_v15 = vpop.eup %1157 }
 0x186   :  { %v506_v19 = vmul.f32 %v1158_v15, %v1851_v58 }
 0x187   :  { %587 = vrot.lane.b32.xlu0 %v523_v22, %s1255_s26  ;;  %577 = vrot.lane.b32.xlu1 %v518_v56, %s1255_s26 }
 0x188   :  { %v530_v8 = vmul.f32 %v506_v19, %v1601_v40 }
 0x18b   :  { %581 = vrot.lane.b32.xlu1 %v520_v20, %s1255_s26  ;;  %591 = vrot.lane.b32.xlu0 %v525_v3, %s1255_s26 }
 0x18f   :  { %585 = vrot.lane.b32.xlu1 %v522_v44, %s1255_s26  ;;  %595 = vrot.lane.b32.xlu0 %v527_v29, %s1255_s26 }
 0x193   :  { %589 = vrot.lane.b32.xlu1 %v524_v51, %s1255_s26  ;;  %599 = vrot.lane.b32.xlu0 %v529_v63, %s1255_s26 }
 0x197   :  { %593 = vrot.lane.b32.xlu1 %v526_v10, %s1255_s26  ;;  %748 = vperm.xlu0 %1107, %v502_v50  }
 0x19b   :  { %597 = vrot.lane.b32.xlu1 %v528_v55, %s1255_s26  ;;  %758 = vperm.xlu0 %1107, %v504_v13  }
 0x19f   :  { %601 = vrot.lane.b32.xlu1 %v530_v8, %s1255_s26  ;;  %768 = vperm.xlu0 %1107, %v506_v19   ;;  %v2023_v19 = vld [vmem:[#allocation9_spill] sm:$0xff] }
 0x1a3   :  { %753 = vperm.xlu1 %1108, %v503_v0   ;;  %1110 = vset.pattern.permute.xlu0 %v1256_v62 }
 0x1a7   :  { %763 = vperm.xlu1 %1108, %v505_v42  }
 0x1ab   :  { %1109 = vset.pattern.permute.xlu1 %v1256_v62  ;;  %v2024_v62 = vld [vmem:[#allocation12_spill] sm:$0xff] }
 0x1be   :  { %v1859_v52 = vpop.permute.xlu0 %653 }
 0x1c2   :  { %v1861_v35 = vpop.permute.xlu1 %658 }
 0x1c6   :  { %v1863_v16 = vpop.permute.xlu1 %663  ;;  %v1865_v60 = vpop.permute.xlu0 %668 }
 0x1ca   :  { %v1867_v45 = vpop.permute.xlu1 %673  ;;  %v1869_v48 = vpop.permute.xlu0 %678 }
 0x1ce   :  { %v1871_v40 = vpop.permute.xlu1 %683  ;;  %v1873_v2 = vpop.permute.xlu0 %688 }
 0x1d2   :  { %v1875_v24 = vpop.permute.xlu1 %693  ;;  %v1877_v46 = vpop.permute.xlu0 %698 }
 0x1d6   :  { %v1879_v9 = vpop.permute.xlu1 %703  ;;  %v1881_v38 = vpop.permute.xlu0 %708 }
 0x1da   :  { %v1883_v61 = vpop.permute.xlu1 %713  ;;  %v1885_v7 = vpop.permute.xlu0 %718 }
 0x1de   :  { %v1887_v1 = vpop.permute.xlu1 %723  ;;  %v1889_v11 = vpop.permute.xlu0 %728 }
 0x1e2   :  { %v1891_v43 = vpop.permute.xlu1 %733  ;;  %v1893_v5 = vpop.permute.xlu0 %738 }
 0x1e6   :  { %v1895_v37 = vpop.permute.xlu1 %743  ;;  %v556_v32 = vpop.permute.xlu0 %555 }
 0x1e7   :  { %v627_v39 = vsub.f32 %v1618_v4, %v556_v32 }
 0x1e9   :  { %821 = vperm.xlu1 %1109, %v627_v39   ;;  %v2025_v39 = vld [vmem:[#allocation10_spill] sm:$0xff] }
 0x1ea   :  { %v558_v18 = vpop.permute.xlu1 %557  ;;  %v564_v22 = vpop.permute.xlu0 %563 }
 0x1eb   :  { %v628_v56 = vsub.f32 %v1626_v41, %v558_v18  ;;  %v631_v3 = vsub.f32 %v1652_v27, %v564_v22  ;;  %v2026_v22 = vld [vmem:[#allocation11_spill] sm:$0xff] }
 0x1ed   :  { %826 = vperm.xlu0 %1110, %v628_v56  }
 0x1ee   :  { %v560_v12 = vpop.permute.xlu1 %559  ;;  %v568_v20 = vpop.permute.xlu0 %567 }
 0x1ef   :  { %v629_v0 = vsub.f32 %v1635_v36, %v560_v12  ;;  %v633_v29 = vsub.f32 %v1670_v25, %v568_v20 }
 0x1f1   :  { %831 = vperm.xlu1 %1109, %v629_v0   ;;  %841 = vperm.xlu0 %1110, %v631_v3  }
 0x1f2   :  { %v562_v6 = vpop.permute.xlu1 %561  ;;  %v572_v44 = vpop.permute.xlu0 %571 }
 0x1f3   :  { %v630_v4 = vsub.f32 %v1640_v47, %v562_v6  ;;  %v635_v41 = vsub.f32 %v1688_v53, %v572_v44 }
 0x1f5   :  { %836 = vperm.xlu1 %1109, %v630_v4   ;;  %851 = vperm.xlu0 %1110, %v633_v29  }
 0x1f6   :  { %v566_v42 = vpop.permute.xlu1 %565  ;;  %v576_v14 = vpop.permute.xlu0 %575 }
 0x1f7   :  { %v632_v51 = vsub.f32 %v1657_v54, %v566_v42  ;;  %v637_v63 = vsub.f32 %v1709_v23, %v576_v14 }
 0x1f9   :  { %846 = vperm.xlu1 %1109, %v632_v51   ;;  %861 = vperm.xlu0 %1110, %v635_v41   ;;  %v1160_v41 = vld [vmem:[#allocation2 + $0x8] sm:$0xff] }
 0x1fa   :  { %v570_v27 = vpop.permute.xlu1 %569  ;;  %v580_v36 = vpop.permute.xlu0 %579  ;;  %v772_v51 = vmul.f32 %v1160_v41, %v1859_v52 }
 0x1fb   :  { %v634_v50 = vsub.f32 %v1675_v33, %v570_v27  ;;  %v639_v57 = vsub.f32 %v1724_v21, %v580_v36 }
 0x1fd   :  { %856 = vperm.xlu1 %1109, %v634_v50   ;;  %871 = vperm.xlu0 %1110, %v637_v63   ;;  %v1161_v63 = vld [vmem:[#allocation2 + $0x10] sm:$0xff] }
 0x1fe   :  { %v574_v25 = vpop.permute.xlu1 %573  ;;  %v584_v47 = vpop.permute.xlu0 %583  ;;  %v773_v50 = vmul.f32 %v1161_v63, %v1861_v35 }
 0x1ff   :  { %v636_v10 = vsub.f32 %v1693_v49, %v574_v25  ;;  %v641_v13 = vsub.f32 %v1739_v59, %v584_v47  ;;  %v1162_v25 = vld [vmem:[#allocation2 + $0x18] sm:$0xff] }
 0x200   :  { %v774_v47 = vmul.f32 %v1162_v25, %v1861_v35 }
 0x201   :  { %866 = vperm.xlu1 %1109, %v636_v10   ;;  %881 = vperm.xlu0 %1110, %v639_v57  }
 0x202   :  { %v578_v53 = vpop.permute.xlu1 %577  ;;  %v588_v54 = vpop.permute.xlu0 %587 }
 0x203   :  { %v638_v15 = vsub.f32 %v1704_v28, %v578_v53  ;;  %v643_v55 = vsub.f32 %v1754_v17, %v588_v54 }
 0x205   :  { %876 = vperm.xlu1 %1109, %v638_v15   ;;  %891 = vperm.xlu0 %1110, %v641_v13  }
 0x206   :  { %v582_v23 = vpop.permute.xlu1 %581  ;;  %v592_v33 = vpop.permute.xlu0 %591 }
 0x207   :  { %v640_v8 = vsub.f32 %v2023_v19, %v582_v23  ;;  %v645_v32 = vsub.f32 %v2024_v62, %v592_v33  ;;  %v1164_v23 = vld [vmem:[#allocation2 + $0x28] sm:$0xff] }
 0x208   :  { %v776_v33 = vmul.f32 %v1164_v23, %v1863_v16 }
 0x209   :  { %886 = vperm.xlu1 %1109, %v640_v8   ;;  %901 = vperm.xlu0 %1110, %v643_v55   ;;  %v1165_v55 = vld [vmem:[#allocation2 + $0x40] sm:$0xff]  ;;  %v1166_v8 = vld [vmem:[#allocation2 + $0x48] sm:$0xff] }
 0x20a   :  { %v586_v21 = vpop.permute.xlu1 %585  ;;  %v596_v49 = vpop.permute.xlu0 %595  ;;  %v779_v19 = vmul.f32 %v1165_v55, %v1867_v45  ;;  %v780_v35 = vmul.f32 %v1166_v8, %v1867_v45 }
 0x20b   :  { %v642_v18 = vsub.f32 %v2025_v39, %v586_v21  ;;  %v647_v28 = vsub.f32 %v1809_v26, %v596_v49 }
 0x20d   :  { %896 = vperm.xlu1 %1109, %v642_v18   ;;  %911 = vperm.xlu0 %1110, %v645_v32  }
 0x20e   :  { %v590_v59 = vpop.permute.xlu1 %589  ;;  %v600_v12 = vpop.permute.xlu0 %599 }
 0x20f   :  { %v644_v56 = vsub.f32 %v2026_v22, %v590_v59  ;;  %v649_v20 = vsub.f32 %v1820_v34, %v600_v12  ;;  %v1159_v34 = vld [vmem:[#allocation2] sm:$0xff]  ;;  %v1167_v22 = vld [vmem:[#allocation2 + $0x30] sm:$0xff] }
 0x211   :  { %906 = vperm.xlu1 %1109, %v644_v56   ;;  %921 = vperm.xlu0 %1110, %v647_v28   ;;  %v1168_v56 = vld [vmem:[#allocation2 + $0x38] sm:$0xff] }
 0x212   :  { %v594_v17 = vpop.permute.xlu1 %593  ;;  %v1921_v26 = vpop.permute.xlu0 %748  ;;  %v778_v12 = vmul.f32 %v1168_v56, %v1865_v60 }
 0x213   :  { %v646_v3 = vsub.f32 %v1831_v30, %v594_v17  ;;  %v771_v30 = vmul.f32 %v1159_v34, %v1859_v52  ;;  %v1163_v52 = vld [vmem:[#allocation2 + $0x20] sm:$0xff] }
 0x214   :  { %v775_v15 = vmul.f32 %v1163_v52, %v1863_v16  ;;  %v777_v16 = vmul.f32 %v1167_v22, %v1865_v60  ;;  %v1169_v17 = vld [vmem:[#allocation2 + $0x60] sm:$0xff] }
 0x215   :  { %916 = vperm.xlu1 %1109, %v646_v3   ;;  %931 = vperm.xlu0 %1110, %v649_v20   ;;  %v783_v45 = vmul.f32 %v1169_v17, %v1871_v40  ;;  %v1170_v20 = vld [vmem:[#allocation2 + $0x68] sm:$0xff] }
 0x216   :  { %v598_v0 = vpop.permute.xlu1 %597  ;;  %v1925_v42 = vpop.permute.xlu0 %758  ;;  %v784_v3 = vmul.f32 %v1170_v20, %v1871_v40  ;;  %v1172_v40 = vld [vmem:[#allocation2 + $0x58] sm:$0xff] }
 0x217   :  { %v648_v6 = vsub.f32 %v1842_v31, %v598_v0  ;;  %v782_v63 = vmul.f32 %v1172_v40, %v1869_v48 }
 0x219   :  { %926 = vperm.xlu1 %1109, %v648_v6  }
 0x21a   :  { %v602_v44 = vpop.permute.xlu1 %601  ;;  %v1931_v31 = vpop.permute.xlu0 %768 }
 0x21b   :  { %v650_v29 = vsub.f32 %v1851_v58, %v602_v44 }
 0x21d   :  { %936 = vperm.xlu1 %1109, %v650_v29  }
 0x21e   :  { %v1923_v4 = vpop.permute.xlu1 %753 }
 0x222   :  { %v1927_v14 = vpop.permute.xlu1 %763 }
 0x264   :  { %v822_v27 = vpop.permute.xlu1 %821 }
 0x265   :  { %v939_v36 = vadd.f32 %v822_v27, %v771_v30  ;;  %v940_v58 = vadd.f32 %v822_v27, %v772_v51 }
 0x267   :  { %v987_v57 = vmax.f32 %v939_v36, 0.0  ;;  %v988_v10 = vmax.f32 %v940_v58, 0.0  ;;  %v1171_v36 = vld [vmem:[#allocation2 + $0x50] sm:$0xff] }
 0x268   :  { %v827_v53 = vpop.permute.xlu0 %826  ;;  %v781_v58 = vmul.f32 %v1171_v36, %v1869_v48 }
 0x269   :  { %1035 = vst [vmem:[#allocation5] sm:$0xff] %v987_v57  ;;  %1036 = vst.msk [vmem:[#allocation5 + $0x8] sm:$0xff] %vm74_vm0, %v988_v10  ;;  %v941_v54 = vadd.f32 %v827_v53, %v773_v50  ;;  %v942_v13 = vadd.f32 %v827_v53, %v774_v47  ;;  %v1173_v50 = vld [vmem:[#allocation2 + $0x80] sm:$0xff]  ;;  %v1174_v47 = vld [vmem:[#allocation2 + $0x88] sm:$0xff] }
 0x26a   :  { %v787_v25 = vmul.f32 %v1173_v50, %v1875_v24  ;;  %v788_v57 = vmul.f32 %v1174_v47, %v1875_v24  ;;  %v1176_v24 = vld [vmem:[#allocation2 + $0x78] sm:$0xff]  ;;  %v1185_v47 = vld [vmem:[#allocation2 + $0xe0] sm:$0xff] }
 0x26b   :  { %v989_v21 = vmax.f32 %v941_v54, 0.0  ;;  %v990_v49 = vmax.f32 %v942_v13, 0.0 }
 0x26c   :  { %v832_v62 = vpop.permute.xlu1 %831  ;;  %v842_v32 = vpop.permute.xlu0 %841 }
 0x26d   :  { %1037 = vst [vmem:[#allocation5 + $0x10] sm:$0xff] %v989_v21  ;;  %1038 = vst.msk [vmem:[#allocation5 + $0x18] sm:$0xff] %vm74_vm0, %v990_v49  ;;  %v943_v39 = vadd.f32 %v832_v62, %v775_v15  ;;  %v944_v18 = vadd.f32 %v832_v62, %v776_v33  ;;  %v947_v59 = vadd.f32 %v842_v32, %v779_v19  ;;  %v1175_v19 = vld [vmem:[#allocation2 + $0x70] sm:$0xff]  ;;  %v1177_v21 = vld [vmem:[#allocation2 + $0xa0] sm:$0xff] }
 0x26e   :  { %v948_v28 = vadd.f32 %v842_v32, %v780_v35  ;;  %v785_v8 = vmul.f32 %v1175_v19, %v1873_v2  ;;  %v786_v35 = vmul.f32 %v1176_v24, %v1873_v2  ;;  %v791_v49 = vmul.f32 %v1177_v21, %v1879_v9  ;;  %v1178_v62 = vld [vmem:[#allocation2 + $0xa8] sm:$0xff]  ;;  %v1189_v21 = vld [vmem:[#allocation2 + $0x100] sm:$0xff] }
 0x26f   :  { %v991_v0 = vmax.f32 %v943_v39, 0.0  ;;  %v992_v6 = vmax.f32 %v944_v18, 0.0  ;;  %v995_v44 = vmax.f32 %v947_v59, 0.0  ;;  %v792_v32 = vmul.f32 %v1178_v62, %v1879_v9  ;;  %v1180_v9 = vld [vmem:[#allocation2 + $0x98] sm:$0xff]  ;;  %v1190_v62 = vld [vmem:[#allocation2 + $0x108] sm:$0xff] }
 0x270   :  { %v996_v29 = vmax.f32 %v948_v28, 0.0  ;;  %v837_v34 = vpop.permute.xlu1 %836  ;;  %v852_v30 = vpop.permute.xlu0 %851 }
 0x271   :  { %1039 = vst [vmem:[#allocation5 + $0x20] sm:$0xff] %v991_v0  ;;  %1040 = vst.msk [vmem:[#allocation5 + $0x28] sm:$0xff] %vm74_vm0, %v992_v6  ;;  %v945_v41 = vadd.f32 %v837_v34, %v777_v16  ;;  %v946_v60 = vadd.f32 %v837_v34, %v778_v12  ;;  %v951_v51 = vadd.f32 %v852_v30, %v783_v45  ;;  %v1179_v45 = vld [vmem:[#allocation2 + $0x90] sm:$0xff]  ;;  %v1181_v0 = vld [vmem:[#allocation2 + $0xc0] sm:$0xff] }
 0x272   :  { %1043 = vst [vmem:[#allocation5 + $0x40] sm:$0xff] %v995_v44  ;;  %1044 = vst.msk [vmem:[#allocation5 + $0x48] sm:$0xff] %vm74_vm0, %v996_v29  ;;  %v952_v27 = vadd.f32 %v852_v30, %v784_v3  ;;  %v789_v20 = vmul.f32 %v1179_v45, %v1877_v46  ;;  %v790_v3 = vmul.f32 %v1180_v9, %v1877_v46  ;;  %v1182_v44 = vld [vmem:[#allocation2 + $0xc8] sm:$0xff]  ;;  %v1193_v9 = vld [vmem:[#allocation2 + $0x120] sm:$0xff] }
 0x273   :  { %v993_v10 = vmax.f32 %v945_v41, 0.0  ;;  %v994_v53 = vmax.f32 %v946_v60, 0.0  ;;  %v999_v54 = vmax.f32 %v951_v51, 0.0  ;;  %v795_v6 = vmul.f32 %v1181_v0, %v1883_v61  ;;  %v1194_v0 = vld [vmem:[#allocation2 + $0x128] sm:$0xff] }
 0x274   :  { %v1000_v13 = vmax.f32 %v952_v27, 0.0  ;;  %v847_v52 = vpop.permute.xlu1 %846  ;;  %v862_v15 = vpop.permute.xlu0 %861  ;;  %v796_v29 = vmul.f32 %v1182_v44, %v1883_v61  ;;  %v1184_v61 = vld [vmem:[#allocation2 + $0xb8] sm:$0xff] }
 0x275   :  { %1041 = vst [vmem:[#allocation5 + $0x30] sm:$0xff] %v993_v10  ;;  %1042 = vst.msk [vmem:[#allocation5 + $0x38] sm:$0xff] %vm74_vm0, %v994_v53  ;;  %v949_v23 = vadd.f32 %v847_v52, %v781_v58  ;;  %v950_v48 = vadd.f32 %v847_v52, %v782_v63  ;;  %v955_v33 = vadd.f32 %v862_v15, %v787_v25  ;;  %v1183_v63 = vld [vmem:[#allocation2 + $0xb0] sm:$0xff]  ;;  %v1186_v10 = vld [vmem:[#allocation2 + $0xe8] sm:$0xff] }
 0x276   :  { %1047 = vst [vmem:[#allocation5 + $0x60] sm:$0xff] %v999_v54  ;;  %1048 = vst.msk [vmem:[#allocation5 + $0x68] sm:$0xff] %vm74_vm0, %v1000_v13  ;;  %v956_v55 = vadd.f32 %v862_v15, %v788_v57  ;;  %v793_v50 = vmul.f32 %v1183_v63, %v1881_v38  ;;  %v794_v25 = vmul.f32 %v1184_v61, %v1881_v38  ;;  %v1197_v63 = vld [vmem:[#allocation2 + $0x140] sm:$0xff]  ;;  %v1198_v61 = vld [vmem:[#allocation2 + $0x148] sm:$0xff] }
 0x277   :  { %v997_v39 = vmax.f32 %v949_v23, 0.0  ;;  %v998_v18 = vmax.f32 %v950_v48, 0.0  ;;  %v1003_v59 = vmax.f32 %v955_v33, 0.0  ;;  %v799_v57 = vmul.f32 %v1185_v47, %v1887_v1 }
 0x278   :  { %v1004_v28 = vmax.f32 %v956_v55, 0.0  ;;  %v857_v22 = vpop.permute.xlu1 %856  ;;  %v872_v16 = vpop.permute.xlu0 %871  ;;  %v800_v53 = vmul.f32 %v1186_v10, %v1887_v1  ;;  %v1188_v1 = vld [vmem:[#allocation2 + $0xd8] sm:$0xff] }
 0x279   :  { %1045 = vst [vmem:[#allocation5 + $0x50] sm:$0xff] %v997_v39  ;;  %1046 = vst.msk [vmem:[#allocation5 + $0x58] sm:$0xff] %vm74_vm0, %v998_v18  ;;  %v953_v56 = vadd.f32 %v857_v22, %v785_v8  ;;  %v954_v2 = vadd.f32 %v857_v22, %v786_v35  ;;  %v959_v12 = vadd.f32 %v872_v16, %v791_v49  ;;  %v1187_v8 = vld [vmem:[#allocation2 + $0xd0] sm:$0xff] }
 0x27a   :  { %1051 = vst [vmem:[#allocation5 + $0x80] sm:$0xff] %v1003_v59  ;;  %1052 = vst.msk [vmem:[#allocation5 + $0x88] sm:$0xff] %vm74_vm0, %v1004_v28  ;;  %v960_v17 = vadd.f32 %v872_v16, %v792_v32  ;;  %v797_v24 = vmul.f32 %v1187_v8, %v1885_v7  ;;  %v798_v35 = vmul.f32 %v1188_v1, %v1885_v7  ;;  %v1202_v8 = vld [vmem:[#allocation2 + $0x168] sm:$0xff] }
 0x27b   :  { %v1001_v34 = vmax.f32 %v953_v56, 0.0  ;;  %v1002_v30 = vmax.f32 %v954_v2, 0.0  ;;  %v1007_v41 = vmax.f32 %v959_v12, 0.0  ;;  %v803_v49 = vmul.f32 %v1189_v21, %v1891_v43 }
 0x27c   :  { %v1008_v60 = vmax.f32 %v960_v17, 0.0  ;;  %v867_v51 = vpop.permute.xlu1 %866  ;;  %v882_v27 = vpop.permute.xlu0 %881  ;;  %v804_v32 = vmul.f32 %v1190_v62, %v1891_v43  ;;  %v1191_v17 = vld [vmem:[#allocation2 + $0xf0] sm:$0xff]  ;;  %v1192_v43 = vld [vmem:[#allocation2 + $0xf8] sm:$0xff] }
 0x27d   :  { %1049 = vst [vmem:[#allocation5 + $0x70] sm:$0xff] %v1001_v34  ;;  %1050 = vst.msk [vmem:[#allocation5 + $0x78] sm:$0xff] %vm74_vm0, %v1002_v30  ;;  %v957_v36 = vadd.f32 %v867_v51, %v789_v20  ;;  %v958_v46 = vadd.f32 %v867_v51, %v790_v3  ;;  %v963_v58 = vadd.f32 %v882_v27, %v795_v6 }
 0x27e   :  { %1055 = vst [vmem:[#allocation5 + $0xa0] sm:$0xff] %v1007_v41  ;;  %1056 = vst.msk [vmem:[#allocation5 + $0xa8] sm:$0xff] %vm74_vm0, %v1008_v60  ;;  %v964_v40 = vadd.f32 %v882_v27, %v796_v29  ;;  %v801_v45 = vmul.f32 %v1191_v17, %v1889_v11  ;;  %v802_v20 = vmul.f32 %v1192_v43, %v1889_v11 }
 0x27f   :  { %v1005_v54 = vmax.f32 %v957_v36, 0.0  ;;  %v1006_v13 = vmax.f32 %v958_v46, 0.0  ;;  %v1011_v52 = vmax.f32 %v963_v58, 0.0  ;;  %v807_v3 = vmul.f32 %v1193_v9, %v1895_v37  ;;  %v1195_v46 = vld [vmem:[#allocation2 + $0x110] sm:$0xff] }
 0x280   :  { %v1012_v15 = vmax.f32 %v964_v40, 0.0  ;;  %v877_v23 = vpop.permute.xlu1 %876  ;;  %v892_v48 = vpop.permute.xlu0 %891  ;;  %v808_v6 = vmul.f32 %v1194_v0, %v1895_v37  ;;  %v805_v58 = vmul.f32 %v1195_v46, %v1893_v5  ;;  %v1196_v37 = vld [vmem:[#allocation2 + $0x118] sm:$0xff] }
 0x281   :  { %1053 = vst [vmem:[#allocation5 + $0x90] sm:$0xff] %v1005_v54  ;;  %1054 = vst.msk [vmem:[#allocation5 + $0x98] sm:$0xff] %vm74_vm0, %v1006_v13  ;;  %v961_v33 = vadd.f32 %v877_v23, %v793_v50  ;;  %v962_v38 = vadd.f32 %v877_v23, %v794_v25  ;;  %v967_v55 = vadd.f32 %v892_v48, %v799_v57 }
 0x282   :  { %1059 = vst [vmem:[#allocation5 + $0xc0] sm:$0xff] %v1011_v52  ;;  %1060 = vst.msk [vmem:[#allocation5 + $0xc8] sm:$0xff] %vm74_vm0, %v1012_v15  ;;  %v968_v19 = vadd.f32 %v892_v48, %v800_v53  ;;  %v806_v40 = vmul.f32 %v1196_v37, %v1893_v5  ;;  %v811_v50 = vmul.f32 %v1197_v63, %v1923_v4  ;;  %v1199_v48 = vld [vmem:[#allocation2 + $0x130] sm:$0xff] }
 0x283   :  { %v1009_v39 = vmax.f32 %v961_v33, 0.0  ;;  %v1010_v18 = vmax.f32 %v962_v38, 0.0  ;;  %v1015_v59 = vmax.f32 %v967_v55, 0.0  ;;  %v812_v25 = vmul.f32 %v1198_v61, %v1923_v4  ;;  %v1200_v4 = vld [vmem:[#allocation2 + $0x138] sm:$0xff]  ;;  %v1201_v55 = vld [vmem:[#allocation2 + $0x160] sm:$0xff] }
 0x284   :  { %v1016_v28 = vmax.f32 %v968_v19, 0.0  ;;  %v887_v22 = vpop.permute.xlu1 %886  ;;  %v902_v16 = vpop.permute.xlu0 %901  ;;  %v809_v33 = vmul.f32 %v1199_v48, %v1921_v26  ;;  %v810_v38 = vmul.f32 %v1200_v4, %v1921_v26  ;;  %v815_v19 = vmul.f32 %v1201_v55, %v1927_v14 }
 0x285   :  { %1057 = vst [vmem:[#allocation5 + $0xb0] sm:$0xff] %v1009_v39  ;;  %1058 = vst.msk [vmem:[#allocation5 + $0xb8] sm:$0xff] %vm74_vm0, %v1010_v18  ;;  %v965_v56 = vadd.f32 %v887_v22, %v797_v24  ;;  %v966_v7 = vadd.f32 %v887_v22, %v798_v35  ;;  %v971_v2 = vadd.f32 %v902_v16, %v803_v49 }
 0x286   :  { %1063 = vst [vmem:[#allocation5 + $0xe0] sm:$0xff] %v1015_v59  ;;  %1064 = vst.msk [vmem:[#allocation5 + $0xe8] sm:$0xff] %vm74_vm0, %v1016_v28  ;;  %v972_v12 = vadd.f32 %v902_v16, %v804_v32  ;;  %v816_v24 = vmul.f32 %v1202_v8, %v1927_v14  ;;  %v1203_v28 = vld [vmem:[#allocation2 + $0x150] sm:$0xff]  ;;  %v1204_v14 = vld [vmem:[#allocation2 + $0x158] sm:$0xff] }
 0x287   :  { %v1013_v44 = vmax.f32 %v965_v56, 0.0  ;;  %v1014_v29 = vmax.f32 %v966_v7, 0.0  ;;  %v1019_v34 = vmax.f32 %v971_v2, 0.0  ;;  %v813_v22 = vmul.f32 %v1203_v28, %v1925_v42 }
 0x288   :  { %v1020_v30 = vmax.f32 %v972_v12, 0.0  ;;  %v897_v41 = vpop.permute.xlu1 %896  ;;  %v912_v60 = vpop.permute.xlu0 %911  ;;  %v814_v16 = vmul.f32 %v1204_v14, %v1925_v42 }
 0x289   :  { %1061 = vst [vmem:[#allocation5 + $0xd0] sm:$0xff] %v1013_v44  ;;  %1062 = vst.msk [vmem:[#allocation5 + $0xd8] sm:$0xff] %vm74_vm0, %v1014_v29  ;;  %v969_v51 = vadd.f32 %v897_v41, %v801_v45  ;;  %v970_v11 = vadd.f32 %v897_v41, %v802_v20  ;;  %v975_v27 = vadd.f32 %v912_v60, %v807_v3  ;;  %v1205_v20 = vld [vmem:[#allocation2 + $0x170] sm:$0xff]  ;;  %v1206_v3 = vld [vmem:[#allocation2 + $0x178] sm:$0xff] }
 0x28a   :  { %1067 = vst [vmem:[#allocation5 + $0x100] sm:$0xff] %v1019_v34  ;;  %1068 = vst.msk [vmem:[#allocation5 + $0x108] sm:$0xff] %vm74_vm0, %v1020_v30  ;;  %v976_v36 = vadd.f32 %v912_v60, %v808_v6  ;;  %v817_v9 = vmul.f32 %v1205_v20, %v1931_v31  ;;  %v818_v0 = vmul.f32 %v1206_v3, %v1931_v31 }
 0x28b   :  { %v1017_v47 = vmax.f32 %v969_v51, 0.0  ;;  %v1018_v57 = vmax.f32 %v970_v11, 0.0  ;;  %v1023_v10 = vmax.f32 %v975_v27, 0.0 }
 0x28c   :  { %v1024_v53 = vmax.f32 %v976_v36, 0.0  ;;  %v907_v54 = vpop.permute.xlu1 %906  ;;  %v922_v13 = vpop.permute.xlu0 %921 }
 0x28d   :  { %1065 = vst [vmem:[#allocation5 + $0xf0] sm:$0xff] %v1017_v47  ;;  %1066 = vst.msk [vmem:[#allocation5 + $0xf8] sm:$0xff] %vm74_vm0, %v1018_v57  ;;  %v973_v52 = vadd.f32 %v907_v54, %v805_v58  ;;  %v974_v5 = vadd.f32 %v907_v54, %v806_v40  ;;  %v979_v15 = vadd.f32 %v922_v13, %v811_v50 }
 0x28e   :  { %1071 = vst [vmem:[#allocation5 + $0x120] sm:$0xff] %v1023_v10  ;;  %1072 = vst.msk [vmem:[#allocation5 + $0x128] sm:$0xff] %vm74_vm0, %v1024_v53  ;;  %v980_v23 = vadd.f32 %v922_v13, %v812_v25 }
 0x28f   :  { %v1021_v1 = vmax.f32 %v973_v52, 0.0  ;;  %v1022_v35 = vmax.f32 %v974_v5, 0.0  ;;  %v1027_v21 = vmax.f32 %v979_v15, 0.0 }
 0x290   :  { %v1028_v49 = vmax.f32 %v980_v23, 0.0  ;;  %v917_v62 = vpop.permute.xlu1 %916  ;;  %v932_v32 = vpop.permute.xlu0 %931 }
 0x291   :  { %1069 = vst [vmem:[#allocation5 + $0x110] sm:$0xff] %v1021_v1  ;;  %1070 = vst.msk [vmem:[#allocation5 + $0x118] sm:$0xff] %vm74_vm0, %v1022_v35  ;;  %v977_v39 = vadd.f32 %v917_v62, %v809_v33  ;;  %v978_v26 = vadd.f32 %v917_v62, %v810_v38  ;;  %v983_v18 = vadd.f32 %v932_v32, %v815_v19 }
 0x292   :  { %1075 = vst [vmem:[#allocation5 + $0x140] sm:$0xff] %v1027_v21  ;;  %1076 = vst.msk [vmem:[#allocation5 + $0x148] sm:$0xff] %vm74_vm0, %v1028_v49  ;;  %v984_v59 = vadd.f32 %v932_v32, %v816_v24 }
 0x293   :  { %v1025_v56 = vmax.f32 %v977_v39, 0.0  ;;  %v1026_v7 = vmax.f32 %v978_v26, 0.0  ;;  %v1031_v2 = vmax.f32 %v983_v18, 0.0 }
 0x294   :  { %v1032_v12 = vmax.f32 %v984_v59, 0.0  ;;  %v927_v17 = vpop.permute.xlu1 %926 }
 0x295   :  { %1073 = vst [vmem:[#allocation5 + $0x130] sm:$0xff] %v1025_v56  ;;  %1074 = vst.msk [vmem:[#allocation5 + $0x138] sm:$0xff] %vm74_vm0, %v1026_v7  ;;  %v981_v45 = vadd.f32 %v927_v17, %v813_v22  ;;  %v982_v43 = vadd.f32 %v927_v17, %v814_v16 }
 0x296   :  { %1079 = vst [vmem:[#allocation5 + $0x160] sm:$0xff] %v1031_v2  ;;  %1080 = vst.msk [vmem:[#allocation5 + $0x168] sm:$0xff] %vm74_vm0, %v1032_v12 }
 0x297   :  { %v1029_v42 = vmax.f32 %v981_v45, 0.0  ;;  %v1030_v6 = vmax.f32 %v982_v43, 0.0 }
 0x298   :  { %v937_v44 = vpop.permute.xlu1 %936 }
 0x299   :  { %1077 = vst [vmem:[#allocation5 + $0x150] sm:$0xff] %v1029_v42  ;;  %1078 = vst.msk [vmem:[#allocation5 + $0x158] sm:$0xff] %vm74_vm0, %v1030_v6  ;;  %v985_v29 = vadd.f32 %v937_v44, %v817_v9  ;;  %v986_v34 = vadd.f32 %v937_v44, %v818_v0 }
 0x29b   :  { %v1033_v30 = vmax.f32 %v985_v29, 0.0  ;;  %v1034_v41 = vmax.f32 %v986_v34, 0.0 }
 0x29d   :  { %1081 = vst [vmem:[#allocation5 + $0x170] sm:$0xff] %v1033_v30  ;;  %1082 = vst.msk [vmem:[#allocation5 + $0x178] sm:$0xff] %vm74_vm0, %v1034_v41 }
 0x29e   :  { %1238 = shalt.err (!%p1235_p9)
}
 0x29f   :  { %1094 = dma.vmem_to_hbm [thread:$0]  %s1089_s9, 6144, %s2011_s2, [#allocation4], %s1252_s12, %s1252_s12, %s1253_s13  }
 0x2a0   :  { %1249 = dma.done.wait [#allocation4], 6144  }
 0x2a1   :  { %1250 = vsyncadd [#allocation4], 4294961152 }
 0x2a2   :  { %1098 = vsyncpa [#allocation3], 1 }
 0x2a3   :  { %1099 = vsyncpa [#allocation4], 1 }

</bundles_post_ra>
